<compile_context>
chip_gen: v6e
topology: v6e:2x2x1
jax: 0.10.0
libtpu: 0.0.40
codegen_flags: <defaults>
</compile_context>

<pallas_src>
import functools

import jax
import jax.numpy as jnp
from jax.experimental import pallas as pl
from jax.experimental.pallas import tpu as pltpu


def _decoder_reg_kernel(scalars_ref, h_ref, w_ref, b_ref, wl_ref, bl_ref,
                        en3_ref, mask_ref, out_ref):
    """One F-tile of both FC matmuls + squared-error partial sums.

    scalars_ref : (1,)  SMEM int32, [task_p]
    h_ref       : (B, hidden)        encoder hidden vector (en_features[-1])
    w_ref       : (hidden, tile_F)   decoder FC weight tile
    b_ref       : (1, tile_F)        decoder FC bias tile
    wl_ref      : (hidden, tile_F)   last_decoder FC weight tile
    bl_ref      : (1, tile_F)        last_decoder FC bias tile
    en3_ref     : (B, tile_F)        en_features[3] flattened NCHW, F-tile
    mask_ref    : (B, 1)             1.0 where tasks != task_p else 0.0
    out_ref     : (1, 2) f32         [sum_sq1, masked sum_sq2] accumulator
    """
    k = pl.program_id(0)

    @pl.when(k == 0)
    def _init():
        out_ref[...] = jnp.zeros_like(out_ref)

    h = h_ref[...]
    en3 = en3_ref[...].astype(jnp.float32)
    lane = jax.lax.broadcasted_iota(jnp.int32, (1, 2), 1)   # [[0, 1]]

    # --- current decoder: de3 tile = h @ W[:, tile] + b[tile] ----------------
    de3 = jnp.dot(h, w_ref[...], preferred_element_type=jnp.float32)
    de3 = de3 + b_ref[...].astype(jnp.float32)
    d1 = en3 - de3
    s1 = jnp.sum(d1 * d1)
    out_ref[...] += jnp.where(lane == 0, s1, 0.0)

    # --- last decoder on the (tasks != task_p) subset, only if task_p > 0 ----
    @pl.when(scalars_ref[0] > 0)
    def _last_decoder():
        de3_l = jnp.dot(h, wl_ref[...], preferred_element_type=jnp.float32)
        de3_l = de3_l + bl_ref[...].astype(jnp.float32)
        d2 = en3 - de3_l
        # Mask the (B,1) row sums instead of the full (B, tile_F) tile.
        row_sq = jnp.sum(d2 * d2, axis=1, keepdims=True)
        s2 = jnp.sum(row_sq * mask_ref[...].astype(jnp.float32))
        out_ref[...] += jnp.where(lane == 1, s2, 0.0)


def _pick_tile_f(F, cap=512):
    """Largest multiple-of-128 tile <= cap that divides F, else full F."""
    if F % 128 != 0 or F <= cap:
        return F
    t = cap - (cap % 128)
    while t >= 128:
        if F % t == 0:
            return t
        t -= 128
    return F


@functools.partial(jax.jit, static_argnames=("loss_weight",))
def decoder_regularization_forward(en_features, tasks, task_p, params,
                                   last_params, loss_weight):
    """Functional equivalent of decoder_regularization.forward.

    en_features : list of arrays; only [3] (B, C, H, W) and [-1] (B, hidden) used.
    tasks       : (B,) int32 task ids per sample.
    task_p      : scalar int32 current task id (runtime value, no recompile).
    params      : dict with 'w' (hidden, F) and 'b' (F,) for the live decoder.
    last_params : same structure for the deep-copied last_decoder.
    """
    h = en_features[-1]                                     # (B, hidden), native dtype
    en3 = en_features[3]                                    # (B, C, Hs, Ws) NCHW
    B = en3.shape[0]
    en3_flat = en3.reshape(B, -1)                           # (B, F), C*H*W order
    F = en3_flat.shape[1]
    hidden = h.shape[1]

    w = params["w"]                                         # (hidden, F), native dtype
    b = params["b"].reshape(1, F)
    wl = last_params["w"]
    bl = last_params["b"].reshape(1, F)

    task_p = jnp.asarray(task_p, jnp.int32)
    sel = tasks != task_p
    mask = sel.astype(jnp.float32).reshape(B, 1)
    n_sel = jnp.sum(sel.astype(jnp.int32))
    scalars = task_p.reshape(1)                             # scalar prefetch (SMEM)

    tile_f = _pick_tile_f(F)
    grid = (F // tile_f,)

    def _col_map(k, sc):                 # regular F-tiled operands
        return (0, k)

    def _gated_col_map(k, sc):
        # task_p == 0  ->  last_decoder branch is dead: keep re-using block 0
        # so the unused wl/bl weights are DMA'd once, not once per grid step.
        return (0, jnp.where(sc[0] > 0, k, 0))

    grid_spec = pltpu.PrefetchScalarGridSpec(
        num_scalar_prefetch=1,
        grid=grid,
        in_specs=[
            pl.BlockSpec((B, hidden), lambda k, sc: (0, 0)),        # h (resident)
            pl.BlockSpec((hidden, tile_f), _col_map),               # w
            pl.BlockSpec((1, tile_f), _col_map),                    # b
            pl.BlockSpec((hidden, tile_f), _gated_col_map),         # wl
            pl.BlockSpec((1, tile_f), _gated_col_map),              # bl
            pl.BlockSpec((B, tile_f), _col_map),                    # en3
            pl.BlockSpec((B, 1), lambda k, sc: (0, 0)),             # mask (resident)
        ],
        out_specs=pl.BlockSpec((1, 2), lambda k, sc: (0, 0)),       # accumulator
    )

    sums = pl.pallas_call(
        _decoder_reg_kernel,
        out_shape=jax.ShapeDtypeStruct((1, 2), jnp.float32),
        grid_spec=grid_spec,
        compiler_params=pltpu.CompilerParams(
            dimension_semantics=("arbitrary",),        # reduction over F-tiles
            vmem_limit_bytes=32 * 1024 * 1024),
    )(scalars, h, w, b, wl, bl, en3_flat, mask)

    loss1 = sums[0, 0] / jnp.float32(B * F)
    denom2 = jnp.maximum(n_sel, 1).astype(jnp.float32) * jnp.float32(F)
    # torch: loss2 stays 0 when task_p == 0 (last_decoder branch not taken).
    loss2 = jnp.where(task_p > 0, sums[0, 1] / denom2, jnp.float32(0.0))
    return loss1 * loss_weight, loss2 * loss_weight


def _reference(en_features, tasks, task_p, params, last_params, loss_weight):
    """Plain-JAX (f32) reference for correctness checking."""
    h = en_features[-1].astype(jnp.float32)
    en3 = en_features[3].astype(jnp.float32)
    B = en3.shape[0]
    en3_flat = en3.reshape(B, -1)
    w = params["w"].astype(jnp.float32)
    b = params["b"].astype(jnp.float32)
    wl = last_params["w"].astype(jnp.float32)
    bl = last_params["b"].astype(jnp.float32)
    de3 = h @ w + b[None, :]
    loss1 = jnp.mean((en3_flat - de3) ** 2)
    sel = tasks != task_p
    de3_last = h @ wl + bl[None, :]
    d2 = (en3_flat - de3_last) ** 2
    loss2 = jnp.sum(d2 * sel[:, None]) / (
        jnp.maximum(jnp.sum(sel), 1) * en3_flat.shape[1])
    loss2 = jnp.where(task_p > 0, loss2, 0.0)
    return loss1 * loss_weight, loss2 * loss_weight


if __name__ == "__main__":
    # Small config mimicking parameters[data_name]:
    #   pool_size=4, nf=8, hidden_size=64  ->  de_features[3]: (B, 64, 4, 4)
    B, hidden, nf, pool = 8, 64, 8, 4
    C = nf * 8                      # 64 channels in layer-4 style feature
    F = C * pool * pool             # 1024  (tiled over 2 grid steps of 512)
    loss_weight = 0.5

    key = jax.random.PRNGKey(0)
    k1, k2, k3, k4, k5, k6 = jax.random.split(key, 6)

    # Encoder features (only index 3 and -1 are consumed by the module).
    en_feat3 = jax.random.normal(k1, (B, C, pool, pool), dtype=jnp.float32)
    en_hidden = jax.random.normal(k2, (B, hidden), dtype=jnp.float32)
    en_features = [
        jnp.zeros((B, nf, 16, 16), jnp.float32),       # placeholder shallow feats
        jnp.zeros((B, nf * 2, 8, 8), jnp.float32),
        jnp.zeros((B, nf * 4, 4, 4), jnp.float32),
        en_feat3,
        en_hidden,
    ]

    # Synthetic decoder FC params (torch Linear(hidden, F), stored transposed
    # as (hidden, F) for the matmul).
    scale = 1.0 / jnp.sqrt(jnp.float32(hidden))
    params = {
        "w": jax.random.uniform(k3, (hidden, F), jnp.float32, -scale, scale),
        "b": jax.random.uniform(k4, (F,), jnp.float32, -scale, scale),
    }
    last_params = {
        "w": params["w"] + 0.01 * jax.random.normal(k5, (hidden, F), jnp.float32),
        "b": params["b"] + 0.01 * jax.random.normal(k6, (F,), jnp.float32),
    }

    tasks = jnp.array([0, 0, 1, 1, 0, 1, 0, 1], dtype=jnp.int32)

    # --- f32, task_p > 0 (both losses active) --------------------------------
    task_p = jnp.int32(1)
    l1, l2 = decoder_regularization_forward(
        en_features, tasks, task_p, params, last_params, loss_weight)
    l1, l2 = jax.block_until_ready((l1, l2))
    r1, r2 = _reference(en_features, tasks, task_p, params, last_params, loss_weight)
    assert jnp.allclose(l1, r1, rtol=1e-5, atol=1e-5), (l1, r1)
    assert jnp.allclose(l2, r2, rtol=1e-5, atol=1e-5), (l2, r2)

    # --- f32, task_p == 0 (last_decoder branch gated off) --------------------
    task_p0 = jnp.int32(0)
    l1z, l2z = decoder_regularization_forward(
        en_features, tasks, task_p0, params, last_params, loss_weight)
    l1z, l2z = jax.block_until_ready((l1z, l2z))
    r1z, r2z = _reference(en_features, tasks, task_p0, params, last_params, loss_weight)
    assert jnp.allclose(l1z, r1z, rtol=1e-5, atol=1e-5), (l1z, r1z)
    assert jnp.allclose(l2z, 0.0, atol=1e-7), l2z
    assert jnp.allclose(r2z, 0.0, atol=1e-7), r2z

    # --- bf16 inputs pass straight through (no f32 upcast in HBM) ------------
    en_features_bf = [f.astype(jnp.bfloat16) for f in en_features]
    params_bf = {k_: v.astype(jnp.bfloat16) for k_, v in params.items()}
    last_params_bf = {k_: v.astype(jnp.bfloat16) for k_, v in last_params.items()}
    b1, b2 = decoder_regularization_forward(
        en_features_bf, tasks, task_p, params_bf, last_params_bf, loss_weight)
    b1, b2 = jax.block_until_ready((b1, b2))
    # Reference on the same bf16-rounded values, computed in f32.
    rb1, rb2 = _reference(en_features_bf, tasks, task_p, params_bf,
                          last_params_bf, loss_weight)
    assert jnp.allclose(b1, rb1, rtol=1e-2, atol=1e-3), (b1, rb1)
    assert jnp.allclose(b2, rb2, rtol=1e-2, atol=1e-3), (b2, rb2)

    print("KERNEL_OK")
</pallas_src>

<mosaic_0001>
module attributes {stable_mosaic.version = 11 : i64} {
  func.func @_decoder_reg_kernel(%arg0: i32, %arg1: memref<1xi32, #tpu.memory_space<smem>>, %arg2: memref<8x64xf32, #tpu.memory_space<vmem>>, %arg3: memref<64x512xf32, #tpu.memory_space<vmem>>, %arg4: memref<1x512xf32, #tpu.memory_space<vmem>>, %arg5: memref<64x512xf32, #tpu.memory_space<vmem>>, %arg6: memref<1x512xf32, #tpu.memory_space<vmem>>, %arg7: memref<8x512xf32, #tpu.memory_space<vmem>>, %arg8: memref<8x1xf32, #tpu.memory_space<vmem>>, %arg9: memref<1x2xf32, #tpu.memory_space<vmem>>) attributes {dimension_semantics = [#tpu.dimension_semantics<arbitrary>], iteration_bounds = array<i64: 2>, scalar_prefetch = 1 : i64, scratch_operands = 0 : i64, tpu.core_type = #tpu.core_type<tc>, window_params = [{pipeline_mode = #tpu.pipeline_mode<synchronous>, transform_indices = @transform_0, window_bounds = array<i64: 8, 64>}, {transform_indices = @transform_1, window_bounds = array<i64: 64, 512>}, {transform_indices = @transform_2, window_bounds = array<i64: 1, 512>}, {transform_indices = @transform_3, window_bounds = array<i64: 64, 512>}, {transform_indices = @transform_4, window_bounds = array<i64: 1, 512>}, {transform_indices = @transform_5, window_bounds = array<i64: 8, 512>}, {pipeline_mode = #tpu.pipeline_mode<synchronous>, transform_indices = @transform_6, window_bounds = array<i64: 8, 1>}, {pipeline_mode = #tpu.pipeline_mode<synchronous>, transform_indices = @transform_7, window_bounds = array<i64: 1, 2>}]} {
    %c0_i32 = arith.constant 0 : i32
    %0 = arith.cmpi eq, %arg0, %c0_i32 : i32
    %1 = arith.extui %0 : i1 to i32
    %c0_i32_0 = arith.constant 0 : i32
    %2 = arith.cmpi ne, %1, %c0_i32_0 : i32
    scf.if %2 {
      %cst_18 = arith.constant 0.000000e+00 : f32
      %29 = vector.broadcast %cst_18 : f32 to vector<1x2xf32>
      %c0_19 = arith.constant 0 : index
      %c0_20 = arith.constant 0 : index
      %30 = vector.load %arg9[%c0_19, %c0_20] : memref<1x2xf32, #tpu.memory_space<vmem>>, vector<1x2xf32>
      tpu.vector_store %arg9[%c0_19, %c0_20], %29 {strides = array<i32>} : memref<1x2xf32, #tpu.memory_space<vmem>>, vector<1x2xf32>,
    } else {
    }
    %c0 = arith.constant 0 : index
    %c0_1 = arith.constant 0 : index
    %3 = vector.load %arg2[%c0, %c0_1] : memref<8x64xf32, #tpu.memory_space<vmem>>, vector<8x64xf32>
    %c0_2 = arith.constant 0 : index
    %c0_3 = arith.constant 0 : index
    %4 = vector.load %arg7[%c0_2, %c0_3] : memref<8x512xf32, #tpu.memory_space<vmem>>, vector<8x512xf32>
    %5 = tpu.iota {dimensions = array<i32: 1>} : vector<1x2xi32>
    %c0_4 = arith.constant 0 : index
    %c0_5 = arith.constant 0 : index
    %6 = vector.load %arg3[%c0_4, %c0_5] : memref<64x512xf32, #tpu.memory_space<vmem>>, vector<64x512xf32>
    %cst = arith.constant dense<0.000000e+00> : vector<8x512xf32>
    %7 = tpu.matmul %3, %6, %cst {dimension_numbers = #tpu.dot_dimension_numbers<[1], [0], [0], [1], [0, 0, 1, 1], [], []>} : vector<8x64xf32>, vector<64x512xf32>, vector<8x512xf32> -> vector<8x512xf32>
    %c0_6 = arith.constant 0 : index
    %c0_7 = arith.constant 0 : index
    %8 = vector.load %arg4[%c0_6, %c0_7] : memref<1x512xf32, #tpu.memory_space<vmem>>, vector<1x512xf32>
    %9 = vector.broadcast %8 : vector<1x512xf32> to vector<8x512xf32>
    %10 = arith.addf %7, %9 : vector<8x512xf32>
    %11 = arith.subf %4, %10 : vector<8x512xf32>
    %12 = arith.mulf %11, %11 : vector<8x512xf32>
    %13 = vector.shape_cast %12 : vector<8x512xf32> to vector<1x8x512xf32>
    %cst_8 = arith.constant dense<0.000000e+00> : vector<1xf32>
    %14 = vector.multi_reduction <add>, %13, %cst_8 [1, 2] : vector<1x8x512xf32> to vector<1xf32>
    %15 = vector.shape_cast %14 : vector<1xf32> to vector<1x1x1xf32>
    %16 = vector.extract %15[0, 0, 0] : f32 from vector<1x1x1xf32>
    %c0_9 = arith.constant 0 : index
    %c0_10 = arith.constant 0 : index
    %17 = vector.load %arg9[%c0_9, %c0_10] : memref<1x2xf32, #tpu.memory_space<vmem>>, vector<1x2xf32>
    %c0_i32_11 = arith.constant 0 : i32
    %18 = vector.broadcast %c0_i32_11 : i32 to vector<1x2xi32>
    %19 = arith.cmpi eq, %5, %18 : vector<1x2xi32>
    %cst_12 = arith.constant 0.000000e+00 : f32
    %20 = vector.broadcast %16 : f32 to vector<1x2xf32>
    %21 = vector.broadcast %cst_12 : f32 to vector<1x2xf32>
    %22 = arith.select %19, %20, %21 : vector<1x2xi1>, vector<1x2xf32>
    %23 = arith.addf %17, %22 : vector<1x2xf32>
    %c0_13 = arith.constant 0 : index
    %c0_14 = arith.constant 0 : index
    %24 = vector.load %arg9[%c0_13, %c0_14] : memref<1x2xf32, #tpu.memory_space<vmem>>, vector<1x2xf32>
    tpu.vector_store %arg9[%c0_13, %c0_14], %23 {strides = array<i32>} : memref<1x2xf32, #tpu.memory_space<vmem>>, vector<1x2xf32>,
    %c0_15 = arith.constant 0 : index
    %25 = memref.load %arg1[%c0_15] : memref<1xi32, #tpu.memory_space<smem>>
    %c0_i32_16 = arith.constant 0 : i32
    %26 = arith.cmpi sgt, %25, %c0_i32_16 : i32
    %27 = arith.extui %26 : i1 to i32
    %c0_i32_17 = arith.constant 0 : i32
    %28 = arith.cmpi ne, %27, %c0_i32_17 : i32
    scf.if %28 {
      %c0_18 = arith.constant 0 : index
      %c0_19 = arith.constant 0 : index
      %29 = vector.load %arg5[%c0_18, %c0_19] : memref<64x512xf32, #tpu.memory_space<vmem>>, vector<64x512xf32>
      %cst_20 = arith.constant dense<0.000000e+00> : vector<8x512xf32>
      %30 = tpu.matmul %3, %29, %cst_20 {dimension_numbers = #tpu.dot_dimension_numbers<[1], [0], [0], [1], [0, 0, 1, 1], [], []>} : vector<8x64xf32>, vector<64x512xf32>, vector<8x512xf32> -> vector<8x512xf32>
      %c0_21 = arith.constant 0 : index
      %c0_22 = arith.constant 0 : index
      %31 = vector.load %arg6[%c0_21, %c0_22] : memref<1x512xf32, #tpu.memory_space<vmem>>, vector<1x512xf32>
      %32 = vector.broadcast %31 : vector<1x512xf32> to vector<8x512xf32>
      %33 = arith.addf %30, %32 : vector<8x512xf32>
      %34 = arith.subf %4, %33 : vector<8x512xf32>
      %35 = arith.mulf %34, %34 : vector<8x512xf32>
      %cst_23 = arith.constant dense<0.000000e+00> : vector<8xf32>
      %36 = vector.multi_reduction <add>, %35, %cst_23 [1] : vector<8x512xf32> to vector<8xf32>
      %37 = vector.shape_cast %36 : vector<8xf32> to vector<8x1xf32>
      %c0_24 = arith.constant 0 : index
      %c0_25 = arith.constant 0 : index
      %38 = vector.load %arg8[%c0_24, %c0_25] : memref<8x1xf32, #tpu.memory_space<vmem>>, vector<8x1xf32>
      %39 = arith.mulf %37, %38 : vector<8x1xf32>
      %40 = vector.shape_cast %39 : vector<8x1xf32> to vector<1x8x1xf32>
      %cst_26 = arith.constant dense<0.000000e+00> : vector<1xf32>
      %41 = vector.multi_reduction <add>, %40, %cst_26 [1, 2] : vector<1x8x1xf32> to vector<1xf32>
      %42 = vector.shape_cast %41 : vector<1xf32> to vector<1x1x1xf32>
      %43 = vector.extract %42[0, 0, 0] : f32 from vector<1x1x1xf32>
      %c0_27 = arith.constant 0 : index
      %c0_28 = arith.constant 0 : index
      %44 = vector.load %arg9[%c0_27, %c0_28] : memref<1x2xf32, #tpu.memory_space<vmem>>, vector<1x2xf32>
      %c1_i32 = arith.constant 1 : i32
      %45 = vector.broadcast %c1_i32 : i32 to vector<1x2xi32>
      %46 = arith.cmpi eq, %5, %45 : vector<1x2xi32>
      %cst_29 = arith.constant 0.000000e+00 : f32
      %47 = vector.broadcast %43 : f32 to vector<1x2xf32>
      %48 = vector.broadcast %cst_29 : f32 to vector<1x2xf32>
      %49 = arith.select %46, %47, %48 : vector<1x2xi1>, vector<1x2xf32>
      %50 = arith.addf %44, %49 : vector<1x2xf32>
      %c0_30 = arith.constant 0 : index
      %c0_31 = arith.constant 0 : index
      %51 = vector.load %arg9[%c0_30, %c0_31] : memref<1x2xf32, #tpu.memory_space<vmem>>, vector<1x2xf32>
      tpu.vector_store %arg9[%c0_30, %c0_31], %50 {strides = array<i32>} : memref<1x2xf32, #tpu.memory_space<vmem>>, vector<1x2xf32>,
    } else {
    }
    return
  }
  func.func @transform_0(%arg0: i32, %arg1: memref<1xi32, #tpu.memory_space<smem>>) -> (i32, i32) {
    %c0_i32 = arith.constant 0 : i32
    %c0_i32_0 = arith.constant 0 : i32
    %c0_i32_1 = arith.constant 0 : i32
    return %c0_i32, %c0_i32_0 : i32, i32
  }
  func.func @transform_1(%arg0: i32, %arg1: memref<1xi32, #tpu.memory_space<smem>>) -> (i32, i32) {
    %c0_i32 = arith.constant 0 : i32
    %c0_i32_0 = arith.constant 0 : i32
    return %c0_i32, %arg0 : i32, i32
  }
  func.func @transform_2(%arg0: i32, %arg1: memref<1xi32, #tpu.memory_space<smem>>) -> (i32, i32) {
    %c0_i32 = arith.constant 0 : i32
    %c0_i32_0 = arith.constant 0 : i32
    return %c0_i32, %arg0 : i32, i32
  }
  func.func @transform_3(%arg0: i32, %arg1: memref<1xi32, #tpu.memory_space<smem>>) -> (i32, i32) {
    %c0 = arith.constant 0 : index
    %0 = memref.load %arg1[%c0] : memref<1xi32, #tpu.memory_space<smem>>
    %c0_i32 = arith.constant 0 : i32
    %1 = arith.cmpi sgt, %0, %c0_i32 : i32
    %c0_i32_0 = arith.constant 0 : i32
    %2 = arith.select %1, %arg0, %c0_i32_0 : i32
    %c0_i32_1 = arith.constant 0 : i32
    %c0_i32_2 = arith.constant 0 : i32
    return %c0_i32_1, %2 : i32, i32
  }
  func.func @transform_4(%arg0: i32, %arg1: memref<1xi32, #tpu.memory_space<smem>>) -> (i32, i32) {
    %c0 = arith.constant 0 : index
    %0 = memref.load %arg1[%c0] : memref<1xi32, #tpu.memory_space<smem>>
    %c0_i32 = arith.constant 0 : i32
    %1 = arith.cmpi sgt, %0, %c0_i32 : i32
    %c0_i32_0 = arith.constant 0 : i32
    %2 = arith.select %1, %arg0, %c0_i32_0 : i32
    %c0_i32_1 = arith.constant 0 : i32
    %c0_i32_2 = arith.constant 0 : i32
    return %c0_i32_1, %2 : i32, i32
  }
  func.func @transform_5(%arg0: i32, %arg1: memref<1xi32, #tpu.memory_space<smem>>) -> (i32, i32) {
    %c0_i32 = arith.constant 0 : i32
    %c0_i32_0 = arith.constant 0 : i32
    return %c0_i32, %arg0 : i32, i32
  }
  func.func @transform_6(%arg0: i32, %arg1: memref<1xi32, #tpu.memory_space<smem>>) -> (i32, i32) {
    %c0_i32 = arith.constant 0 : i32
    %c0_i32_0 = arith.constant 0 : i32
    %c0_i32_1 = arith.constant 0 : i32
    return %c0_i32, %c0_i32_0 : i32, i32
  }
  func.func @transform_7(%arg0: i32, %arg1: memref<1xi32, #tpu.memory_space<smem>>) -> (i32, i32) {
    %c0_i32 = arith.constant 0 : i32
    %c0_i32_0 = arith.constant 0 : i32
    %c0_i32_1 = arith.constant 0 : i32
    return %c0_i32, %c0_i32_0 : i32, i32
  }
}

</mosaic_0001>

<bundles_post_ra>
// kernel: decoder_regularization_forward.1
= control target key start
LH: loop header
LB: loop body
LE: loop exit
PB: predicated region body
PF: predicated region fallthrough
CT: control target
= control target key end

     0   :  { %s1663_s0 = inlined_call_operand.<no memory space> [shape: s32[1], index: 0, kind: input, shape index: {}]   ;;  %s1664_s1 = inlined_call_operand.vmem [shape: f32[8,64], index: 1, kind: input, shape index: {}]   ;;  %s1665_s2 = inlined_call_operand.vmem [shape: f32[64,1024], index: 2, kind: input, shape index: {}]   ;;  %s1666_s3 = inlined_call_operand.vmem [shape: f32[1,1024], index: 3, kind: input, shape index: {}]   ;;  %s1667_s4 = inlined_call_operand.vmem [shape: f32[64,1024], index: 4, kind: input, shape index: {}]   ;;  %s1668_s5 = inlined_call_operand.vmem [shape: f32[1,1024], index: 5, kind: input, shape index: {}]   ;;  %s1669_s6 = inlined_call_operand.vmem [shape: f32[8,1024], index: 6, kind: input, shape index: {}]   ;;  %s1670_s7 = inlined_call_operand.vmem [shape: f32[8,1], index: 7, kind: input, shape index: {}]   ;;  %s1671_s8 = inlined_call_operand.vmem [shape: f32[1,2], index: 8, kind: output, shape index: {}]  }
   0x1   :  { %13 = sst [smem:[#allocation3]] %s1663_s0 }
   0x2   :  { %s1264_s29 = smov 0   ;;  %s1266_s30 = smov 0  }
   0x3   :  { %s1268_s9 = smov 0   ;;  %s1270_s10 = smov 0  }
   0x4   :  { %s1272_s11 = smov 0  }
   0x5 LB: > { %s1290_s0 = sadd.s32 4294967295, %s1211_s11   ;;  %s1293_s12 = sadd.s32 1, %s1211_s11   ;;  %s1211_s11 = sphi %s1272_s11, %s1677_s11   ;;  %s1207_s10 = sphi %s1270_s10, %s1676_s10   ;;  %s1203_s9 = sphi %s1268_s9, %s1675_s9   ;;  %s1199_s30 = sphi %s1266_s30, %s1674_s30   ;;  %s1195_s29 = sphi %s1264_s29, %s1673_s29  }
   0x6   : > { %s44_s13 = ssub.s32 %s1211_s11, %s1293_s12  ;;  %s47_s14 = sadd.s32 1, %s1207_s10 }
   0x7   : > { %p45_p0 = scmp.eq.s32.totalorder %s44_s13, 0  ;;  %p54_p1 = scmp.ne.s32.totalorder %s1207_s10, %s1203_s9 }
   0x8   : > { %p55_p2 = scmp.eq.s32.totalorder %s1211_s11, 0  ;;  %s96_s15 = sld [smem:[#allocation3]] }
   0x9   : > { %s1302_s16 = scalar_select %p45_p0, %s1207_s10, %s47_s14  }
   0xa   : > { %p56_p3 = por %p55_p2, %p54_p1  ;;  %p112_p4 = scmp.ne.s32.totalorder %s1199_s30, %s1195_s29 }
   0xb   : > { %s105_s21 = sadd.s32 1, %s1199_s30  ;;  %p1102_p8 = scmp.ge.s32.totalorder %s1211_s11, 2 }
   0xc   : > { %p1306_p5 = por %p112_p4, %p55_p2 }
   0xe   : > { %p97_p6 = scmp.gt.s32.totalorder %s96_s15, 0 }
  0x10   : > { %s98_s18 = scalar_select %p97_p6, %s1211_s11, 0 }
  0x11   : > { %s101_s19 = scalar_select %p97_p6, %s1293_s12, 0 }
  0x12   : > { %244 = sbr.rel (%p1102_p8) target bundleno = 72 (0x48), region = 24 }
  0x13   : > { %s102_s20 = ssub.s32 %s98_s18, %s101_s19 }
  0x14   : > { %p103_p7 = scmp.eq.s32.totalorder %s102_s20, 0 }
  0x16   : > { %s1314_s22 = scalar_select %p103_p7, %s1199_s30, %s105_s21  }
  0x17   : > { %247 = sbr.rel (!%p56_p3) target bundleno = 43 (0x2b), region = 28  ;;  %s249_s23 = sand.u32 (%p56_p3), 1, %s1207_s10  }
  0x18   : > { %s1124_s24 = sshll.u32 (%p56_p3), %s1211_s11, 5  ;;  %s1103_s25 = sshll.u32 (%p56_p3), %s249_s23, 8 }
  0x19   : > { %s1322_s28 = scalar_lea.vmem (%p56_p3), %s1665_s2, %s1124_s24  ;;  %s1327_s13 = scalar_lea.vmem (%p56_p3), [#allocation4], %s1103_s25 }
  0x1a   : > { %v267_v0 = vld [vmem:[%s1322_s28] sm:$0xff] (%p56_p3)  ;;  %v269_v1 = vld [vmem:[%s1322_s28 + $0x8] sm:$0xff] (%p56_p3)  ;;  %v271_v2 = vld [vmem:[%s1322_s28 + $0x10] sm:$0xff] (%p56_p3) }
  0x1b   : > { %268 = vst [vmem:[%s1327_s13] sm:$0xff] (%p56_p3), %v267_v0  ;;  %270 = vst [vmem:[%s1327_s13 + $0x8] sm:$0xff] (%p56_p3), %v269_v1  ;;  %v273_v3 = vld [vmem:[%s1322_s28 + $0x18] sm:$0xff] (%p56_p3)  ;;  %v275_v4 = vld [vmem:[%s1322_s28 + $0x40] sm:$0xff] (%p56_p3) }
  0x1c   : > { %272 = vst [vmem:[%s1327_s13 + $0x10] sm:$0xff] %v271_v2  ;;  %v277_v5 = vld [vmem:[%s1322_s28 + $0x48] sm:$0xff]  ;;  %274 = vst [vmem:[%s1327_s13 + $0x18] sm:$0xff] %v273_v3  ;;  %v279_v6 = vld [vmem:[%s1322_s28 + $0x50] sm:$0xff] }
  0x1d   : > { %276 = vst [vmem:[%s1327_s13 + $0x20] sm:$0xff] %v275_v4  ;;  %278 = vst [vmem:[%s1327_s13 + $0x28] sm:$0xff] %v277_v5  ;;  %v281_v7 = vld [vmem:[%s1322_s28 + $0x58] sm:$0xff]  ;;  %v283_v8 = vld [vmem:[%s1322_s28 + $0x80] sm:$0xff] }
  0x1e   : > { %280 = vst [vmem:[%s1327_s13 + $0x30] sm:$0xff] %v279_v6  ;;  %282 = vst [vmem:[%s1327_s13 + $0x38] sm:$0xff] %v281_v7  ;;  %v285_v9 = vld [vmem:[%s1322_s28 + $0x88] sm:$0xff]  ;;  %v287_v10 = vld [vmem:[%s1322_s28 + $0x90] sm:$0xff] }
  0x1f   : > { %284 = vst [vmem:[%s1327_s13 + $0x40] sm:$0xff] %v283_v8  ;;  %v289_v11 = vld [vmem:[%s1322_s28 + $0x98] sm:$0xff]  ;;  %286 = vst [vmem:[%s1327_s13 + $0x48] sm:$0xff] %v285_v9  ;;  %v291_v12 = vld [vmem:[%s1322_s28 + $0xc0] sm:$0xff] }
  0x20   : > { %288 = vst [vmem:[%s1327_s13 + $0x50] sm:$0xff] %v287_v10  ;;  %290 = vst [vmem:[%s1327_s13 + $0x58] sm:$0xff] %v289_v11  ;;  %v293_v13 = vld [vmem:[%s1322_s28 + $0xc8] sm:$0xff]  ;;  %v295_v14 = vld [vmem:[%s1322_s28 + $0xd0] sm:$0xff] }
  0x21   : > { %292 = vst [vmem:[%s1327_s13 + $0x60] sm:$0xff] %v291_v12  ;;  %294 = vst [vmem:[%s1327_s13 + $0x68] sm:$0xff] %v293_v13  ;;  %v297_v15 = vld [vmem:[%s1322_s28 + $0xd8] sm:$0xff]  ;;  %v299_v16 = vld [vmem:[%s1322_s28 + $0x100] sm:$0xff] }
  0x22   : > { %296 = vst [vmem:[%s1327_s13 + $0x70] sm:$0xff] %v295_v14  ;;  %v301_v17 = vld [vmem:[%s1322_s28 + $0x108] sm:$0xff]  ;;  %298 = vst [vmem:[%s1327_s13 + $0x78] sm:$0xff] %v297_v15  ;;  %v303_v18 = vld [vmem:[%s1322_s28 + $0x110] sm:$0xff] }
  0x23   : > { %300 = vst [vmem:[%s1327_s13 + $0x80] sm:$0xff] %v299_v16  ;;  %302 = vst [vmem:[%s1327_s13 + $0x88] sm:$0xff] %v301_v17  ;;  %v305_v19 = vld [vmem:[%s1322_s28 + $0x118] sm:$0xff]  ;;  %v307_v20 = vld [vmem:[%s1322_s28 + $0x140] sm:$0xff] }
  0x24   : > { %304 = vst [vmem:[%s1327_s13 + $0x90] sm:$0xff] %v303_v18  ;;  %306 = vst [vmem:[%s1327_s13 + $0x98] sm:$0xff] %v305_v19  ;;  %v309_v21 = vld [vmem:[%s1322_s28 + $0x148] sm:$0xff]  ;;  %v311_v22 = vld [vmem:[%s1322_s28 + $0x150] sm:$0xff] }
  0x25   : > { %308 = vst [vmem:[%s1327_s13 + $0xa0] sm:$0xff] %v307_v20  ;;  %v313_v23 = vld [vmem:[%s1322_s28 + $0x158] sm:$0xff]  ;;  %310 = vst [vmem:[%s1327_s13 + $0xa8] sm:$0xff] %v309_v21  ;;  %v315_v24 = vld [vmem:[%s1322_s28 + $0x180] sm:$0xff] }
  0x26   : > { %312 = vst [vmem:[%s1327_s13 + $0xb0] sm:$0xff] %v311_v22  ;;  %314 = vst [vmem:[%s1327_s13 + $0xb8] sm:$0xff] %v313_v23  ;;  %v317_v25 = vld [vmem:[%s1322_s28 + $0x188] sm:$0xff]  ;;  %v319_v26 = vld [vmem:[%s1322_s28 + $0x190] sm:$0xff] }
  0x27   : > { %316 = vst [vmem:[%s1327_s13 + $0xc0] sm:$0xff] %v315_v24  ;;  %318 = vst [vmem:[%s1327_s13 + $0xc8] sm:$0xff] %v317_v25  ;;  %v321_v27 = vld [vmem:[%s1322_s28 + $0x198] sm:$0xff]  ;;  %v323_v28 = vld [vmem:[%s1322_s28 + $0x1c0] sm:$0xff] }
  0x28   : > { %320 = vst [vmem:[%s1327_s13 + $0xd0] sm:$0xff] %v319_v26  ;;  %v325_v29 = vld [vmem:[%s1322_s28 + $0x1c8] sm:$0xff]  ;;  %322 = vst [vmem:[%s1327_s13 + $0xd8] sm:$0xff] %v321_v27  ;;  %v327_v30 = vld [vmem:[%s1322_s28 + $0x1d0] sm:$0xff] }
  0x29   : > { %324 = vst [vmem:[%s1327_s13 + $0xe0] sm:$0xff] %v323_v28  ;;  %326 = vst [vmem:[%s1327_s13 + $0xe8] sm:$0xff] %v325_v29  ;;  %v329_v31 = vld [vmem:[%s1322_s28 + $0x1d8] sm:$0xff] }
  0x2a   : > { %328 = vst [vmem:[%s1327_s13 + $0xf0] sm:$0xff] %v327_v30  ;;  %330 = vst [vmem:[%s1327_s13 + $0xf8] sm:$0xff] %v329_v31 }
  0x2b PF: > { %344 = sbr.rel (!%p1306_p5) target bundleno = 72 (0x48), region = 55  ;;  %s349_s14 = sld [smem:[#allocation3]] (%p1306_p5) }
  0x2c   : > { %s346_s15 = sand.u32 (%p1306_p5), 1, %s1199_s30  }
  0x2d   : > { %s1106_s18 = sshll.u32 (%p1306_p5), %s346_s15, 8 }
  0x2e   : > { %s1402_s17 = scalar_lea.vmem (%p1306_p5), [#allocation5], %s1106_s18 }
  0x31   : > { %p350_p9 = scmp.gt.s32.totalorder %s349_s14, 0 }
  0x33   : > { %s351_s19 = scalar_select %p350_p9, %s1211_s11, 0 }
  0x35   : > { %s1125_s20 = sshll.u32 %s351_s19, 5 }
  0x36   : > { %s1397_s24 = scalar_lea.vmem %s1667_s4, %s1125_s20 }
  0x37   : > { %v367_v32 = vld [vmem:[%s1397_s24] sm:$0xff]  ;;  %v369_v33 = vld [vmem:[%s1397_s24 + $0x8] sm:$0xff]  ;;  %v371_v34 = vld [vmem:[%s1397_s24 + $0x10] sm:$0xff] }
  0x38   : > { %368 = vst [vmem:[%s1402_s17] sm:$0xff] %v367_v32  ;;  %370 = vst [vmem:[%s1402_s17 + $0x8] sm:$0xff] %v369_v33  ;;  %v373_v35 = vld [vmem:[%s1397_s24 + $0x18] sm:$0xff]  ;;  %v375_v36 = vld [vmem:[%s1397_s24 + $0x40] sm:$0xff] }
  0x39   : > { %372 = vst [vmem:[%s1402_s17 + $0x10] sm:$0xff] %v371_v34  ;;  %v377_v37 = vld [vmem:[%s1397_s24 + $0x48] sm:$0xff]  ;;  %374 = vst [vmem:[%s1402_s17 + $0x18] sm:$0xff] %v373_v35  ;;  %v379_v38 = vld [vmem:[%s1397_s24 + $0x50] sm:$0xff] }
  0x3a   : > { %376 = vst [vmem:[%s1402_s17 + $0x20] sm:$0xff] %v375_v36  ;;  %378 = vst [vmem:[%s1402_s17 + $0x28] sm:$0xff] %v377_v37  ;;  %v381_v39 = vld [vmem:[%s1397_s24 + $0x58] sm:$0xff]  ;;  %v383_v40 = vld [vmem:[%s1397_s24 + $0x80] sm:$0xff] }
  0x3b   : > { %380 = vst [vmem:[%s1402_s17 + $0x30] sm:$0xff] %v379_v38  ;;  %382 = vst [vmem:[%s1402_s17 + $0x38] sm:$0xff] %v381_v39  ;;  %v385_v41 = vld [vmem:[%s1397_s24 + $0x88] sm:$0xff]  ;;  %v387_v42 = vld [vmem:[%s1397_s24 + $0x90] sm:$0xff] }
  0x3c   : > { %384 = vst [vmem:[%s1402_s17 + $0x40] sm:$0xff] %v383_v40  ;;  %v389_v43 = vld [vmem:[%s1397_s24 + $0x98] sm:$0xff]  ;;  %386 = vst [vmem:[%s1402_s17 + $0x48] sm:$0xff] %v385_v41  ;;  %v391_v44 = vld [vmem:[%s1397_s24 + $0xc0] sm:$0xff] }
  0x3d   : > { %388 = vst [vmem:[%s1402_s17 + $0x50] sm:$0xff] %v387_v42  ;;  %390 = vst [vmem:[%s1402_s17 + $0x58] sm:$0xff] %v389_v43  ;;  %v393_v45 = vld [vmem:[%s1397_s24 + $0xc8] sm:$0xff]  ;;  %v395_v46 = vld [vmem:[%s1397_s24 + $0xd0] sm:$0xff] }
  0x3e   : > { %392 = vst [vmem:[%s1402_s17 + $0x60] sm:$0xff] %v391_v44  ;;  %394 = vst [vmem:[%s1402_s17 + $0x68] sm:$0xff] %v393_v45  ;;  %v397_v47 = vld [vmem:[%s1397_s24 + $0xd8] sm:$0xff]  ;;  %v399_v48 = vld [vmem:[%s1397_s24 + $0x100] sm:$0xff] }
  0x3f   : > { %396 = vst [vmem:[%s1402_s17 + $0x70] sm:$0xff] %v395_v46  ;;  %v401_v49 = vld [vmem:[%s1397_s24 + $0x108] sm:$0xff]  ;;  %398 = vst [vmem:[%s1402_s17 + $0x78] sm:$0xff] %v397_v47  ;;  %v403_v50 = vld [vmem:[%s1397_s24 + $0x110] sm:$0xff] }
  0x40   : > { %400 = vst [vmem:[%s1402_s17 + $0x80] sm:$0xff] %v399_v48  ;;  %402 = vst [vmem:[%s1402_s17 + $0x88] sm:$0xff] %v401_v49  ;;  %v405_v51 = vld [vmem:[%s1397_s24 + $0x118] sm:$0xff]  ;;  %v407_v52 = vld [vmem:[%s1397_s24 + $0x140] sm:$0xff] }
  0x41   : > { %404 = vst [vmem:[%s1402_s17 + $0x90] sm:$0xff] %v403_v50  ;;  %406 = vst [vmem:[%s1402_s17 + $0x98] sm:$0xff] %v405_v51  ;;  %v409_v53 = vld [vmem:[%s1397_s24 + $0x148] sm:$0xff]  ;;  %v411_v54 = vld [vmem:[%s1397_s24 + $0x150] sm:$0xff] }
  0x42   : > { %408 = vst [vmem:[%s1402_s17 + $0xa0] sm:$0xff] %v407_v52  ;;  %v413_v55 = vld [vmem:[%s1397_s24 + $0x158] sm:$0xff]  ;;  %410 = vst [vmem:[%s1402_s17 + $0xa8] sm:$0xff] %v409_v53  ;;  %v415_v56 = vld [vmem:[%s1397_s24 + $0x180] sm:$0xff] }
  0x43   : > { %412 = vst [vmem:[%s1402_s17 + $0xb0] sm:$0xff] %v411_v54  ;;  %414 = vst [vmem:[%s1402_s17 + $0xb8] sm:$0xff] %v413_v55  ;;  %v417_v57 = vld [vmem:[%s1397_s24 + $0x188] sm:$0xff]  ;;  %v419_v58 = vld [vmem:[%s1397_s24 + $0x190] sm:$0xff] }
  0x44   : > { %416 = vst [vmem:[%s1402_s17 + $0xc0] sm:$0xff] %v415_v56  ;;  %418 = vst [vmem:[%s1402_s17 + $0xc8] sm:$0xff] %v417_v57  ;;  %v421_v59 = vld [vmem:[%s1397_s24 + $0x198] sm:$0xff]  ;;  %v423_v60 = vld [vmem:[%s1397_s24 + $0x1c0] sm:$0xff] }
  0x45   : > { %420 = vst [vmem:[%s1402_s17 + $0xd0] sm:$0xff] %v419_v58  ;;  %v425_v61 = vld [vmem:[%s1397_s24 + $0x1c8] sm:$0xff]  ;;  %422 = vst [vmem:[%s1402_s17 + $0xd8] sm:$0xff] %v421_v59  ;;  %v427_v62 = vld [vmem:[%s1397_s24 + $0x1d0] sm:$0xff] }
  0x46   : > { %424 = vst [vmem:[%s1402_s17 + $0xe0] sm:$0xff] %v423_v60  ;;  %426 = vst [vmem:[%s1402_s17 + $0xe8] sm:$0xff] %v425_v61  ;;  %v429_v63 = vld [vmem:[%s1397_s24 + $0x1d8] sm:$0xff] }
  0x47   : > { %428 = vst [vmem:[%s1402_s17 + $0xf0] sm:$0xff] %v427_v62  ;;  %430 = vst [vmem:[%s1402_s17 + $0xf8] sm:$0xff] %v429_v63 }
  0x48 PF: > { %p1109_p10 = scmp.ge.s32.totalorder %s1211_s11, 1  ;;  %p458_p11 = scmp.lt.s32.totalorder %s1211_s11, 3 }
  0x4a   : > { %p459_p12 = pnand %p1109_p10, %p458_p11 }
  0x4b   : > { %s465_s25 = sand.u32 (!%p459_p12), 1, %s1203_s9   ;;  %s472_s26 = sand.u32 (!%p459_p12), 1, %s1195_s29  }
  0x4c   : > { %462 = sbr.rel (%p459_p12) target bundleno = 1094 (0x446), region = 86  ;;  %s1110_s27 = sshll.u32 (!%p459_p12), %s465_s25, 8 }
  0x4d   : > { %s1111_s28 = sshll.u32 (!%p459_p12), %s472_s26, 8  ;;  %s1112_s13 = sshll.u32 (!%p459_p12), %s1290_s0, 2 }
  0x4e   : > { %s528_s14 = sld [smem:[#allocation3]] (!%p459_p12)  ;;  %p520_p13 = scmp.lt.s32.totalorder (!%p459_p12), %s1112_s13, 7 }
  0x4f   : > { %s1489_s26 = scalar_lea.vmem (!%p459_p12), [#allocation4], %s1110_s27  ;;  %s1491_s15 = scalar_lea.vmem (!%p459_p12), [#allocation5], %s1111_s28 }
  0x50   : > { %p1116_p2 = scmp.ne.s32.totalorder (!%p459_p12), %s1290_s0, 0 }
  0x51   : > { %s1679_s13 = smov (!%p520_p13, %s1112_s13), 7 }
  0x52   : > { %s522_s11 = scalar_lea.vmem %s1666_s3, %s1679_s13  ;;  %s1115_s19 = sshll.u32 %s1679_s13, 3 }
  0x53   : > { %s1480_s9 = scalar_lea.vmem %s1669_s6, %s1115_s19 }
  0x54   : > { %p529_p0 = scmp.gt.s32.totalorder %s528_s14, 0 }
  0x56   : > { %s530_s29 = scalar_select %p529_p0, %s1290_s0, 0 }
  0x58   : > { %s1113_s23 = sshll.u32 %s530_s29, 2  ;;  %548 = sbr.rel (%p1116_p2) target bundleno = 95 (0x5f), region = 98 }
  0x59   : > { %p532_p1 = scmp.lt.s32.totalorder %s1113_s23, 7 }
  0x5b   : > { %s1681_s23 = smov (!%p532_p1, %s1113_s23), 7 }
  0x5c   : > { %s534_s25 = scalar_lea.vmem %s1668_s5, %s1681_s23 }
  0x5d   : > { %vm549_vm0 = vcmask 8192   ;;  %v1213_v0 = vmov 0.0  }
  0x5e   : > { %550 = vst.msk [vmem:[%s1671_s8] sm:$0x1] %vm549_vm0, %v1213_v0 }
  0x5f PF: > { %v587_v1 = vld [vmem:[%s1489_s26 + $0xe8] sm:$0xff]  ;;  %v586_v2 = vld [vmem:[%s1489_s26 + $0xe0] sm:$0xff]  ;;  %v589_v4 = vld [vmem:[%s1489_s26 + $0xf8] sm:$0xff]  ;;  %v1214_v7 = vmov 0.0   ;;  %vm612_vm1 = vcmask 523264   ;;  %v556_v35 = vlaneseq  ;;  %s785_s13 = sld [smem:[#allocation3]] }
  0x60   : > { %v583_v3 = vld [vmem:[%s1489_s26 + $0xc8] sm:$0xff]  ;;  %632 = vmatprep.subr.mxu0 %v587_v1  ;;  %v582_v5 = vld [vmem:[%s1489_s26 + $0xc0] sm:$0xff]  ;;  %v588_v6 = vld [vmem:[%s1489_s26 + $0xf0] sm:$0xff]  ;;  %680 = vmatprep.mubr.f32.mxu0 %v1214_v7  ;;  %vm783_vm3 = vcmask 8192  }
  0x61   : > { %633 = vmatpush1.msra.mxu0 %v586_v2  ;;  %703 = vmatprep.subr.mxu1 %v589_v4  ;;  %v579_v8 = vld [vmem:[%s1489_s26 + $0xa8] sm:$0xff]  ;;  %v585_v9 = vld [vmem:[%s1489_s26 + $0xd8] sm:$0xff]  ;;  %v578_v10 = vld [vmem:[%s1489_s26 + $0xa0] sm:$0xff]  ;;  %v1538_v36 = vshrl.u32 %v556_v35, 7 }
  0x62   : > { %634 = vmatprep.subr.mxu0 %v583_v3  ;;  %704 = vmatpush1.msra.mxu1 %v588_v6  ;;  %v584_v11 = vld [vmem:[%s1489_s26 + $0xd0] sm:$0xff]  ;;  %v581_v12 = vld [vmem:[%s1489_s26 + $0xb8] sm:$0xff]  ;;  %v575_v13 = vld [vmem:[%s1489_s26 + $0x88] sm:$0xff] }
  0x63   : > { %635 = vmatpush1.msra.mxu0 %v582_v5  ;;  %705 = vmatprep.subr.mxu1 %v585_v9  ;;  %v580_v14 = vld [vmem:[%s1489_s26 + $0xb0] sm:$0xff]  ;;  %v574_v15 = vld [vmem:[%s1489_s26 + $0x80] sm:$0xff]  ;;  %v577_v16 = vld [vmem:[%s1489_s26 + $0x98] sm:$0xff]  ;;  %v594_v37 = vsub.s32 0, %v1538_v36  ;;  %v598_v39 = vsub.s32 1, %v1538_v36  ;;  %v602_v40 = vsub.s32 2, %v1538_v36 }
  0x64   : > { %636 = vmatprep.subr.mxu0 %v579_v8  ;;  %706 = vmatpush1.msra.mxu1 %v584_v11  ;;  %v571_v17 = vld [vmem:[%s1489_s26 + $0x68] sm:$0xff]  ;;  %v576_v18 = vld [vmem:[%s1489_s26 + $0x90] sm:$0xff]  ;;  %v570_v19 = vld [vmem:[%s1489_s26 + $0x60] sm:$0xff]  ;;  %v606_v42 = vsub.s32 3, %v1538_v36 }
  0x65   : > { %637 = vmatpush1.msra.mxu0 %v578_v10  ;;  %707 = vmatprep.subr.mxu1 %v581_v12  ;;  %v573_v20 = vld [vmem:[%s1489_s26 + $0x78] sm:$0xff]  ;;  %v567_v21 = vld [vmem:[%s1489_s26 + $0x48] sm:$0xff]  ;;  %v572_v22 = vld [vmem:[%s1489_s26 + $0x70] sm:$0xff]  ;;  %v1573_v12 = vand.u32 127, %v556_v35  ;;  %p1119_p3 = scmp.le.s32.totalorder %s785_s13, 0 }
  0x66   : > { %638 = vmatprep.subr.mxu0 %v575_v13  ;;  %708 = vmatpush1.msra.mxu1 %v580_v14  ;;  %v566_v23 = vld [vmem:[%s1489_s26 + $0x40] sm:$0xff]  ;;  %v569_v24 = vld [vmem:[%s1489_s26 + $0x58] sm:$0xff]  ;;  %v563_v25 = vld [vmem:[%s1489_s26 + $0x28] sm:$0xff] }
  0x67   : > { %639 = vmatpush1.msra.mxu0 %v574_v15  ;;  %709 = vmatprep.subr.mxu1 %v577_v16  ;;  %v568_v26 = vld [vmem:[%s1489_s26 + $0x50] sm:$0xff]  ;;  %v562_v27 = vld [vmem:[%s1489_s26 + $0x20] sm:$0xff]  ;;  %v565_v28 = vld [vmem:[%s1489_s26 + $0x38] sm:$0xff]  ;;  %vm779_vm2 = vcmp.eq.s32.totalorder %v1573_v12, 0 }
  0x68   : > { %640 = vmatprep.subr.mxu0 %v571_v17  ;;  %710 = vmatpush1.msra.mxu1 %v576_v18  ;;  %v559_v29 = vld [vmem:[%s1489_s26 + $0x8] sm:$0xff]  ;;  %v564_v30 = vld [vmem:[%s1489_s26 + $0x30] sm:$0xff]  ;;  %v558_v31 = vld [vmem:[%s1489_s26] sm:$0xff] }
  0x69   : > { %641 = vmatpush1.msra.mxu0 %v570_v19  ;;  %711 = vmatprep.subr.mxu1 %v573_v20  ;;  %v561_v32 = vld [vmem:[%s1489_s26 + $0x18] sm:$0xff]  ;;  %v1531_v33 = vld [vmem:[%s1664_s1] sm:$0xff]  ;;  %v560_v34 = vld [vmem:[%s1489_s26 + $0x10] sm:$0xff] }
  0x6a   : > { %642 = vmatprep.subr.mxu0 %v567_v21  ;;  %712 = vmatpush1.msra.mxu1 %v572_v22  ;;  %v590_v38 = vld [vmem:[%s522_s11] sm:$0xf]  ;;  %v1561_v49 = vld [vmem:[%s1480_s9 + $0x8] sm:$0xff]  ;;  %v1564_v51 = vld [vmem:[%s1480_s9 + $0x10] sm:$0xff] }
  0x6b   : > { %643 = vmatpush1.msra.mxu0 %v566_v23  ;;  %713 = vmatprep.subr.mxu1 %v569_v24  ;;  %v595_v41 = vrot.slane %v590_v38, %v594_v37  ;;  %v599_v43 = vrot.slane %v590_v38, %v598_v39  ;;  %v603_v44 = vrot.slane %v590_v38, %v602_v40  ;;  %v1556_v45 = vld [vmem:[%s1480_s9] sm:$0xff]  ;;  %v1568_v57 = vld [vmem:[%s1480_s9 + $0x18] sm:$0xff] }
  0x6c   : > { %644 = vmatprep.subr.mxu0 %v563_v25  ;;  %714 = vmatpush1.msra.mxu1 %v568_v26  ;;  %v607_v48 = vrot.slane %v590_v38, %v606_v42  ;;  %v778_v13 = vld [vmem:[%s1671_s8] sm:$0x1] }
  0x6d   : > { %645 = vmatpush1.msra.mxu0 %v562_v27  ;;  %715 = vmatprep.subr.mxu1 %v565_v28 }
  0x6e   : > { %646 = vmatprep.subr.mxu0 %v559_v29  ;;  %716 = vmatpush1.msra.mxu1 %v564_v30 }
  0x6f   : > { %647 = vmatpush1.msra.mxu0 %v558_v31  ;;  %717 = vmatprep.subr.mxu1 %v561_v32 }
  0x70   : > { %1117 = vmatmul.mubr.msk.f32.vlgmr.msra.gmra.mxu0 %vm612_vm1, %v1531_v33  ;;  %718 = vmatpush1.msra.mxu1 %v560_v34 }
  0x71   : > { %751 = vmatprep.mubr.f32.mxu1 %v1214_v7 }
  0x72   : > { %1118 = vmatmul.mubr.msk.f32.vlgmr.msra.gmra.mxu1 %vm612_vm1, %v1531_v33 }
 0x130   : > { %v682_v46 = vpop.f32.mrf.mxu0 }
 0x131   : > { %v683_v47 = vadd.f32 %v682_v46, %v595_v41 }
 0x132   : > { %v684_v50 = vpop.f32.mrf.mxu0  ;;  %v753_v52 = vpop.f32.mrf.mxu1 }
 0x133   : > { %v758_v53 = vsub.f32 %v1556_v45, %v683_v47  ;;  %v685_v54 = vadd.f32 %v684_v50, %v599_v43  ;;  %v754_v55 = vadd.f32 %v753_v52, %v603_v44 }
 0x134   : > { %v755_v56 = vpop.f32.mrf.mxu1 }
 0x135   : > { %v759_v58 = vsub.f32 %v1561_v49, %v685_v54  ;;  %v760_v59 = vsub.f32 %v1564_v51, %v754_v55  ;;  %v756_v60 = vadd.f32 %v755_v56, %v607_v48  ;;  %v762_v61 = vmul.f32 %v758_v53, %v758_v53 }
 0x137   : > { %v763_v62 = vmul.f32 %v759_v58, %v759_v58  ;;  %v764_v63 = vmul.f32 %v760_v59, %v760_v59  ;;  %v761_v0 = vsub.f32 %v1568_v57, %v756_v60 }
 0x139   : > { %v766_v1 = vadd.f32 %v763_v62, %v762_v61  ;;  %v765_v2 = vmul.f32 %v761_v0, %v761_v0 }
 0x13b   : > { %v767_v3 = vadd.f32 %v766_v1, %v764_v63 }
 0x13d   : > { %v768_v4 = vadd.f32 %v767_v3, %v765_v2 }
 0x13f   : > { %769 = vadd.xlane.f32.xlu0 %v768_v4 }
 0x1c8   : > { %v770_v5 = vpop.xlane.xlu0 %769 }
 0x1c9   : > { %v771_v6 = vrot.slane %v770_v5, 4 }
 0x1cb   : > { %v772_v7 = vadd.f32 %v771_v6, %v770_v5 }
 0x1cd   : > { %v773_v8 = vrot.slane %v772_v7, 2 }
 0x1cf   : > { %v774_v9 = vadd.f32 %v773_v8, %v772_v7 }
 0x1d1   : > { %v775_v10 = vrot.slane %v774_v9, 1 }
 0x1d3   : > { %v776_v11 = vadd.f32 %v775_v10, %v774_v9 }
 0x1d5   : > { %1126 = vpush %v776_v11 }
 0x206   : > { %s1127_s11 = spop %1126 }
 0x207   : > { %v780_v14 = vstv %s1127_s11  ;;  %789 = sbr.rel (%p1119_p3) target bundleno = 1094 (0x446), region = 102 }
 0x208   : > { %v781_v15 = vsel %vm779_vm2, %v780_v14, 0.0 }
 0x209   : > { %v782_v16 = vadd.f32 %v781_v15, %v778_v13 }
 0x20b   : > { %784 = vst.msk [vmem:[%s1671_s8] sm:$0x1] %vm783_vm3, %v782_v16 }
 0x20c   : > { %v819_v17 = vld [vmem:[%s1491_s15 + $0xe8] sm:$0xff]  ;;  %v818_v18 = vld [vmem:[%s1491_s15 + $0xe0] sm:$0xff]  ;;  %v821_v20 = vld [vmem:[%s1491_s15 + $0xf8] sm:$0xff]  ;;  %v1215_v23 = vmov 0.0   ;;  %vm1001_vm4 = vcmask 7168   ;;  %vm1013_vm5 = vcmp.eq.s32.totalorder %v1573_v12, 1 }
 0x20d   : > { %v815_v19 = vld [vmem:[%s1491_s15 + $0xc8] sm:$0xff]  ;;  %860 = vmatprep.subr.mxu0 %v819_v17  ;;  %v814_v21 = vld [vmem:[%s1491_s15 + $0xc0] sm:$0xff]  ;;  %v820_v22 = vld [vmem:[%s1491_s15 + $0xf0] sm:$0xff]  ;;  %908 = vmatprep.mubr.f32.mxu0 %v1215_v23 }
 0x20e   : > { %861 = vmatpush1.msra.mxu0 %v818_v18  ;;  %931 = vmatprep.subr.mxu1 %v821_v20  ;;  %v811_v24 = vld [vmem:[%s1491_s15 + $0xa8] sm:$0xff]  ;;  %v817_v25 = vld [vmem:[%s1491_s15 + $0xd8] sm:$0xff]  ;;  %v810_v26 = vld [vmem:[%s1491_s15 + $0xa0] sm:$0xff] }
 0x20f   : > { %862 = vmatprep.subr.mxu0 %v815_v19  ;;  %932 = vmatpush1.msra.mxu1 %v820_v22  ;;  %v816_v27 = vld [vmem:[%s1491_s15 + $0xd0] sm:$0xff]  ;;  %v813_v28 = vld [vmem:[%s1491_s15 + $0xb8] sm:$0xff]  ;;  %v807_v29 = vld [vmem:[%s1491_s15 + $0x88] sm:$0xff] }
 0x210   : > { %863 = vmatpush1.msra.mxu0 %v814_v21  ;;  %933 = vmatprep.subr.mxu1 %v817_v25  ;;  %v812_v30 = vld [vmem:[%s1491_s15 + $0xb0] sm:$0xff]  ;;  %v806_v31 = vld [vmem:[%s1491_s15 + $0x80] sm:$0xff]  ;;  %v809_v32 = vld [vmem:[%s1491_s15 + $0x98] sm:$0xff] }
 0x211   : > { %864 = vmatprep.subr.mxu0 %v811_v24  ;;  %934 = vmatpush1.msra.mxu1 %v816_v27  ;;  %v803_v34 = vld [vmem:[%s1491_s15 + $0x68] sm:$0xff]  ;;  %v808_v35 = vld [vmem:[%s1491_s15 + $0x90] sm:$0xff]  ;;  %v802_v38 = vld [vmem:[%s1491_s15 + $0x60] sm:$0xff] }
 0x212   : > { %865 = vmatpush1.msra.mxu0 %v810_v26  ;;  %935 = vmatprep.subr.mxu1 %v813_v28  ;;  %v805_v41 = vld [vmem:[%s1491_s15 + $0x78] sm:$0xff]  ;;  %v799_v43 = vld [vmem:[%s1491_s15 + $0x48] sm:$0xff]  ;;  %v804_v44 = vld [vmem:[%s1491_s15 + $0x70] sm:$0xff] }
 0x213   : > { %866 = vmatprep.subr.mxu0 %v807_v29  ;;  %936 = vmatpush1.msra.mxu1 %v812_v30  ;;  %v798_v46 = vld [vmem:[%s1491_s15 + $0x40] sm:$0xff]  ;;  %v801_v47 = vld [vmem:[%s1491_s15 + $0x58] sm:$0xff]  ;;  %v795_v48 = vld [vmem:[%s1491_s15 + $0x28] sm:$0xff] }
 0x214   : > { %867 = vmatpush1.msra.mxu0 %v806_v31  ;;  %937 = vmatprep.subr.mxu1 %v809_v32  ;;  %v800_v50 = vld [vmem:[%s1491_s15 + $0x50] sm:$0xff]  ;;  %v794_v52 = vld [vmem:[%s1491_s15 + $0x20] sm:$0xff]  ;;  %v797_v53 = vld [vmem:[%s1491_s15 + $0x38] sm:$0xff] }
 0x215   : > { %868 = vmatprep.subr.mxu0 %v803_v34  ;;  %938 = vmatpush1.msra.mxu1 %v808_v35  ;;  %v791_v54 = vld [vmem:[%s1491_s15 + $0x8] sm:$0xff]  ;;  %v796_v55 = vld [vmem:[%s1491_s15 + $0x30] sm:$0xff]  ;;  %v790_v56 = vld [vmem:[%s1491_s15] sm:$0xff] }
 0x216   : > { %869 = vmatpush1.msra.mxu0 %v802_v38  ;;  %939 = vmatprep.subr.mxu1 %v805_v41  ;;  %v793_v58 = vld [vmem:[%s1491_s15 + $0x18] sm:$0xff]  ;;  %v792_v59 = vld [vmem:[%s1491_s15 + $0x10] sm:$0xff]  ;;  %v822_v60 = vld [vmem:[%s534_s25] sm:$0xf] }
 0x217   : > { %870 = vmatprep.subr.mxu0 %v799_v43  ;;  %940 = vmatpush1.msra.mxu1 %v804_v44  ;;  %v827_v61 = vrot.slane %v822_v60, %v594_v37  ;;  %v831_v62 = vrot.slane %v822_v60, %v598_v39  ;;  %v835_v63 = vrot.slane %v822_v60, %v602_v40  ;;  %v1012_v22 = vld [vmem:[%s1671_s8] sm:$0x1] }
 0x218   : > { %871 = vmatpush1.msra.mxu0 %v798_v46  ;;  %941 = vmatprep.subr.mxu1 %v801_v47  ;;  %v839_v2 = vrot.slane %v822_v60, %v606_v42 }
 0x219   : > { %872 = vmatprep.subr.mxu0 %v795_v48  ;;  %942 = vmatpush1.msra.mxu1 %v800_v50 }
 0x21a   : > { %873 = vmatpush1.msra.mxu0 %v794_v52  ;;  %943 = vmatprep.subr.mxu1 %v797_v53 }
 0x21b   : > { %874 = vmatprep.subr.mxu0 %v791_v54  ;;  %944 = vmatpush1.msra.mxu1 %v796_v55 }
 0x21c   : > { %875 = vmatpush1.msra.mxu0 %v790_v56  ;;  %945 = vmatprep.subr.mxu1 %v793_v58 }
 0x21d   : > { %1120 = vmatmul.mubr.msk.f32.vlgmr.msra.gmra.mxu0 %vm612_vm1, %v1531_v33  ;;  %946 = vmatpush1.msra.mxu1 %v792_v59 }
 0x21e   : > { %979 = vmatprep.mubr.f32.mxu1 %v1215_v23 }
 0x21f   : > { %1121 = vmatmul.mubr.msk.f32.vlgmr.msra.gmra.mxu1 %vm612_vm1, %v1531_v33 }
 0x2dd   : > { %v910_v0 = vpop.f32.mrf.mxu0 }
 0x2de   : > { %v911_v1 = vadd.f32 %v910_v0, %v827_v61 }
 0x2df   : > { %v912_v33 = vpop.f32.mrf.mxu0  ;;  %v981_v3 = vpop.f32.mrf.mxu1 }
 0x2e0   : > { %v986_v4 = vsub.f32 %v1556_v45, %v911_v1  ;;  %v913_v5 = vadd.f32 %v912_v33, %v831_v62  ;;  %v982_v6 = vadd.f32 %v981_v3, %v835_v63  ;;  %v999_v45 = vld [vmem:[%s1670_s7] sm:$0xff] }
 0x2e1   : > { %v983_v7 = vpop.f32.mrf.mxu1 }
 0x2e2   : > { %v987_v37 = vsub.f32 %v1561_v49, %v913_v5  ;;  %v988_v8 = vsub.f32 %v1564_v51, %v982_v6  ;;  %v984_v39 = vadd.f32 %v983_v7, %v839_v2  ;;  %v990_v9 = vmul.f32 %v986_v4, %v986_v4 }
 0x2e4   : > { %v991_v10 = vmul.f32 %v987_v37, %v987_v37  ;;  %v992_v40 = vmul.f32 %v988_v8, %v988_v8  ;;  %v989_v11 = vsub.f32 %v1568_v57, %v984_v39 }
 0x2e6   : > { %v994_v13 = vadd.f32 %v991_v10, %v990_v9  ;;  %v993_v36 = vmul.f32 %v989_v11, %v989_v11 }
 0x2e8   : > { %v995_v42 = vadd.f32 %v994_v13, %v992_v40 }
 0x2ea   : > { %v996_v14 = vadd.f32 %v995_v42, %v993_v36 }
 0x2ec   : > { %997 = vadd.xlane.f32.xlu0 %v996_v14 }
 0x375   : > { %v998_v15 = vpop.xlane.xlu0 %997 }
 0x376   : > { %v1000_v49 = vmul.f32 %v999_v45, %v998_v15 }
 0x378   : > { %v1002_v16 = vsel %vm1001_vm4, %v1000_v49, 0.0 }
 0x379   : > { %1003 = vadd.xlane.f32.xlu0 %v1002_v16 }
 0x402   : > { %v1004_v51 = vpop.xlane.xlu0 %1003 }
 0x403   : > { %v1005_v17 = vrot.slane %v1004_v51, 4 }
 0x405   : > { %v1006_v18 = vadd.f32 %v1005_v17, %v1004_v51 }
 0x407   : > { %v1007_v19 = vrot.slane %v1006_v18, 2 }
 0x409   : > { %v1008_v20 = vadd.f32 %v1007_v19, %v1006_v18 }
 0x40b   : > { %v1009_v57 = vrot.slane %v1008_v20, 1 }
 0x40d   : > { %v1010_v21 = vadd.f32 %v1009_v57, %v1008_v20 }
 0x40f   : > { %1128 = vpush %v1010_v21 }
 0x440   : > { %s1129_s26 = spop %1128 }
 0x441   : > { %v1014_v23 = vstv %s1129_s26 }
 0x442   : > { %v1015_v24 = vsel %vm1013_vm5, %v1014_v23, 0.0 }
 0x443   : > { %v1016_v25 = vadd.f32 %v1015_v24, %v1012_v22 }
 0x445   : > { %1017 = vst.msk [vmem:[%s1671_s8] sm:$0x1] %vm783_vm3, %v1016_v25 }
 0x446 PF: > { %p16_p4 = scmp.ge.s32.totalorder %s1293_s12, 4   ;;  %s1673_s29 = smov %s1199_s30 }
 0x447   : > { %s1674_s30 = smov %s1314_s22  ;;  %s1675_s9 = smov %s1207_s10 }
 0x448   : > { %s1676_s10 = smov %s1302_s16  ;;  %s1677_s11 = smov %s1293_s12 }
 0x449   :  { %18 = sbr.rel (!%p16_p4) target bundleno = 5 (0x5), region = 150 }

</bundles_post_ra>
